<compile_context>
chip_gen: v7x
topology: tpu7x:2x2x1
jax: 0.10.0
libtpu: 0.0.40
codegen_flags: <defaults>
</compile_context>

<pallas_src>
import functools
import random

import numpy as np
import jax
import jax.numpy as jnp
from jax import lax
from jax.experimental import pallas as pl
from jax.experimental.pallas import tpu as pltpu

EPS = 1e-6    # matches torch.nn.PairwiseDistance(eps=1e-6): ||x1 - x2 + eps||_2
_LANE = 128


def _round_up(x, m):
    return ((x + m - 1) // m) * m


def _vmem_capacity_bytes():
    try:
        return int(pltpu.get_tpu_info().vmem_capacity_bytes)
    except Exception:
        return 64 * 1024 * 1024   # conservative default (v7x physical per-core VMEM)


def _plan_tiles(n, d, in_bytes, out_bytes):
    """Generation-aware tile plan: (tm, tn, tk, n_pad, d_pad, b_buffers, vmem_limit)."""
    cap = _vmem_capacity_bytes()
    budget = min(cap // 2, 96 * 1024 * 1024)           # tile working set <= ~half of VMEM
    n128 = _round_up(max(int(n), 1), _LANE)

    def working_set(tm, tn, dblk, bbuf, ktiled):
        a = 2 * tm * dblk * in_bytes                    # a stream, double-buffered
        b = bbuf * tn * dblk * in_bytes                 # b stream
        rows = 2 * (tm + tn) * 4                        # rowA / rowB blocks
        out = 2 * tm * tn * out_bytes                   # distance output tile
        acc = tm * tn * 4 if ktiled else 0              # f32 accumulator scratch
        return a + b + rows + out + acc

    # Prefer large row tiles (halves b-stream HBM replay), but keep >= 2 row tiles when
    # the batch is big enough so the "parallel" row axis can feed both v7x TensorCores.
    tm_cap = n128 if n128 < 2 * _LANE else max(_LANE, n128 // 2)
    cands = [(tm, tn) for tm, tn in ((512, 256), (256, 256), (256, 128), (128, 128))
             if tm <= tm_cap and tn <= n128]
    if not cands:
        cands = [(min(tm_cap, _LANE), min(n128, _LANE))]

    tm = tn = tk = None
    for ctm, ctn in cands:                              # 1) full-D blocks (no K axis)
        if working_set(ctm, ctn, d, 2, False) <= budget:
            tm, tn, tk = ctm, ctn, None
            break
    if tm is None:                                      # 2) K-tiled contraction
        ctk = min(512, _round_up(d, _LANE))
        for ctm, ctn in cands:
            if working_set(ctm, ctn, ctk, 2, True) <= budget:
                tm, tn, tk = ctm, ctn, ctk
                break
        if tm is None:
            tm, tn, tk = 128, 128, min(512, _round_up(d, _LANE))

    n_pad = _round_up(n128, max(tm, tn))
    d_pad = d if tk is None else _round_up(d, tk)

    # Deeper b-stream buffering when per-step compute is short (small D) and it helps.
    b_buffers = 2
    if (tk is None and d <= 1024 and (n_pad // tn) >= 3
            and working_set(tm, tn, d, 3, False) <= budget):
        b_buffers = 3

    ws = working_set(tm, tn, d if tk is None else tk, b_buffers, tk is not None)
    vmem_limit = int(min(cap * 0.85, max(2 * ws, 32 * 1024 * 1024)))
    return tm, tn, tk, n_pad, d_pad, b_buffers, vmem_limit


def _b_block_spec(shape, index_map, buffers):
    """b-stream BlockSpec, optionally 3-deep buffered (feedback item for small D)."""
    if buffers > 2 and hasattr(pl, "Buffered"):
        try:
            return pl.BlockSpec(shape, index_map, pipeline_mode=pl.Buffered(buffers))
        except TypeError:  # jax version without pipeline_mode on BlockSpec
            pass
    return pl.BlockSpec(shape, index_map)


# -------------------------- Pallas kernels --------------------------

def _dist_kernel(a_ref, b_ref, ra_ref, rb_ref, dist_ref, *, precision):
    """One (TM, TN) tile of the NxN distance matrix (contraction dim un-tiled)."""
    # MXU: gram[m, n] = sum_d a[m, d] * b[n, d]
    gram = lax.dot_general(a_ref[...], b_ref[...], (((1,), (1,)), ((), ())),
                           preferred_element_type=jnp.float32, precision=precision)
    d2 = (ra_ref[...] + rb_ref[...]) - 2.0 * gram        # (TM,1)+(1,TN) broadcast
    dist_ref[...] = jnp.sqrt(jnp.maximum(d2, 0.0)).astype(dist_ref.dtype)


def _dist_kernel_ktiled(a_ref, b_ref, ra_ref, rb_ref, dist_ref, acc_ref, *, precision):
    """Same tile, with the contraction dimension tiled (3rd 'arbitrary' grid axis)."""
    k = pl.program_id(2)

    @pl.when(k == 0)
    def _():
        acc_ref[...] = jnp.zeros_like(acc_ref)

    acc_ref[...] += lax.dot_general(a_ref[...], b_ref[...], (((1,), (1,)), ((), ())),
                                    preferred_element_type=jnp.float32,
                                    precision=precision)

    @pl.when(k == pl.num_programs(2) - 1)
    def _():
        d2 = (ra_ref[...] + rb_ref[...]) - 2.0 * acc_ref[...]
        dist_ref[...] = jnp.sqrt(jnp.maximum(d2, 0.0)).astype(dist_ref.dtype)


def fused_pairwise_distances(embeddings, p_embeddings, *, dist_dtype=jnp.float32,
                             matmul_precision="fast"):
    """Returns (padded NxN distance matrix, padded per-row positive distances, n_pad).

    dist[i, j] = ||x_i - x_j + eps||_2   (anchor vs anchor, Gram trick on the MXU)
    pos[i]     = ||x_i - p_i + eps||_2   (exact direct-difference form, f32)
    """
    embeddings = jnp.asarray(embeddings, jnp.float32)
    p_embeddings = jnp.asarray(p_embeddings, jnp.float32)
    n, d = embeddings.shape

    fast = (matmul_precision == "fast")
    mx_dtype = jnp.bfloat16 if fast else jnp.float32
    precision = None if fast else lax.Precision.HIGHEST
    in_bytes = 2 if fast else 4
    out_bytes = int(jnp.dtype(dist_dtype).itemsize)

    tm, tn, tk, n_pad, d_pad, b_buffers, vmem_limit = _plan_tiles(
        n, d, in_bytes, out_bytes)

    emb, pemb = embeddings, p_embeddings
    if n_pad != n:
        emb = jnp.pad(emb, ((0, n_pad - n), (0, 0)))
        pemb = jnp.pad(pemb, ((0, n_pad - n), (0, 0)))

    # ---- O(N*D) prologue (reductions hoisted out of the (i, j) tile loop) ----
    sq = jnp.sum(emb * emb, axis=1)                      # ||x_i||^2  (exact f32)
    sm = jnp.sum(emb, axis=1)                            # sum_d x_i
    row_a = (sq + (2.0 * EPS) * sm + float(d) * EPS * EPS).reshape(n_pad, 1)
    row_b = (sq - (2.0 * EPS) * sm).reshape(1, n_pad)
    diff = emb - pemb + EPS
    pos = jnp.sqrt(jnp.sum(diff * diff, axis=1))         # exact torch PairwiseDistance

    emb_mx = emb.astype(mx_dtype)
    if tk is not None and d_pad != d:
        emb_mx = jnp.pad(emb_mx, ((0, 0), (0, d_pad - d)))  # zero cols: gram unchanged

    if tk is None:
        grid = (n_pad // tm, n_pad // tn)
        kernel = functools.partial(_dist_kernel, precision=precision)
        in_specs = [
            pl.BlockSpec((tm, d_pad), lambda i, j: (i, 0)),              # anchors (i)
            _b_block_spec((tn, d_pad), lambda i, j: (j, 0), b_buffers),  # anchors (j)
            pl.BlockSpec((tm, 1), lambda i, j: (i, 0)),                  # rowA_i
            pl.BlockSpec((1, tn), lambda i, j: (0, j)),                  # rowB_j
        ]
        out_specs = pl.BlockSpec((tm, tn), lambda i, j: (i, j))
        scratch = []
        semantics = ("parallel", "parallel")
    else:
        grid = (n_pad // tm, n_pad // tn, d_pad // tk)
        kernel = functools.partial(_dist_kernel_ktiled, precision=precision)
        in_specs = [
            pl.BlockSpec((tm, tk), lambda i, j, k: (i, k)),
            pl.BlockSpec((tn, tk), lambda i, j, k: (j, k)),
            pl.BlockSpec((tm, 1), lambda i, j, k: (i, 0)),
            pl.BlockSpec((1, tn), lambda i, j, k: (0, j)),
        ]
        out_specs = pl.BlockSpec((tm, tn), lambda i, j, k: (i, j))
        scratch = [pltpu.VMEM((tm, tn), jnp.float32)]
        semantics = ("parallel", "parallel", "arbitrary")

    dist_pad = pl.pallas_call(
        kernel,
        out_shape=jax.ShapeDtypeStruct((n_pad, n_pad), dist_dtype),
        grid=grid,
        in_specs=in_specs,
        out_specs=out_specs,
        scratch_shapes=scratch,
        compiler_params=pltpu.CompilerParams(
            dimension_semantics=semantics,
            vmem_limit_bytes=vmem_limit),
    )(emb_mx, emb_mx, row_a, row_b)

    return dist_pad, pos, n_pad


# -------------------------- Module equivalent --------------------------

class CustomTripletMarginLossPallas:
    """JAX/Pallas equivalent of the PyTorch CustomTripletMarginLoss forward pass."""

    def __init__(self, loss_type="triplet_margin_loss", margin=1,
                 ratio_hard_easy_negative=0.8, p_norm=2, distance_metric="p_norm",
                 seed=0, matmul_precision="fast", dist_dtype=jnp.float32):
        if distance_metric != "p_norm" or p_norm != 2:
            # TODO(synk): cosine metric and p != 2 p-norms not implemented (module defaults only).
            raise NotImplementedError("Only p_norm=2 distance implemented.")
        if loss_type not in ("triplet_margin_loss", "exponential_distance_loss"):
            raise ValueError(f"unsupported loss_type {loss_type}")
        self.margin = float(margin)
        self.ratio_hard_easy_negative = ratio_hard_easy_negative
        self.loss_type = loss_type
        self.matmul_precision = matmul_precision
        self.dist_dtype = dist_dtype   # bf16 halves the N^2 HBM write + D2H copy
        # Deterministic host-side RNG (the original module uses global random / np.random).
        self._py_rng = random.Random(seed)
        self._np_rng = np.random.default_rng(seed)

    @staticmethod
    def _get_true_negative_indexes(embedding_ids):
        return [[j for j, eid in enumerate(embedding_ids) if eid != anchor_id]
                for anchor_id in embedding_ids]

    def __call__(self, embeddings, p_embeddings, embedding_ids,
                 return_triplet_indexes=False):
        n = int(embeddings.shape[0])

        # --- device: one fused Pallas NxN kernel + O(N*D) prologue; one sync point ---
        dist_pad, pos_pad, _ = fused_pairwise_distances(
            embeddings, p_embeddings,
            dist_dtype=self.dist_dtype, matmul_precision=self.matmul_precision)
        dist_host, pos_host = jax.device_get((dist_pad, pos_pad))
        dmat_np = np.asarray(dist_host, dtype=np.float32)[:n, :n]
        pos_np = np.asarray(pos_host, dtype=np.float32)[:n]
        # TODO(synk): for very large N, fuse per-row semi-hard candidate reductions into
        # the kernel so the full NxN matrix never leaves the device.

        # --- host: semi-hard negative mining (data-dependent python / RNG logic) ---
        tn_indexes = self._get_true_negative_indexes(embedding_ids)
        w_neg = self.ratio_hard_easy_negative
        w_pos = 1.0 - self.ratio_hard_easy_negative
        triplet_indexes, retained_pos, retained_neg = [], [], []
        for a_idx, tn in enumerate(tn_indexes):
            if len(tn) == 0:
                continue
            strictly_hard = self._py_rng.choices(
                population=[True, False], weights=[w_neg, w_pos])[0]
            dists = dmat_np[a_idx, tn]
            thr = 0.0 if strictly_hard else self.margin
            semi = np.where(dists - pos_np[a_idx] < thr)[0].tolist()
            if semi == []:
                semi = [int(np.argmin(dists))]
            chosen = int(self._np_rng.choice(semi))
            neg_idx = tn[chosen]
            triplet_indexes.append((a_idx, neg_idx, a_idx))
            retained_pos.append(pos_np[a_idx])
            retained_neg.append(dmat_np[a_idx, neg_idx])

        if len(triplet_indexes) == 0:
            return (0, 0, 0) if return_triplet_indexes else 0

        pos_arr = np.asarray(retained_pos, dtype=np.float32)
        neg_arr = np.asarray(retained_neg, dtype=np.float32)

        # --- host: tiny final reduction (values already host-resident after mining) ---
        if self.loss_type == "triplet_margin_loss":
            t = np.maximum(pos_arr - neg_arr + self.margin, 0.0)
            loss_s = np.float32(t.mean())
            pmean_s = np.float32(pos_arr.mean())
            nmean_s = np.float32(neg_arr.mean())
        else:  # exponential_distance_loss
            pos_l = 1.0 - np.exp(-pos_arr)
            neg_l = np.exp(-neg_arr)
            pmean_s = np.float32(pos_l.mean())
            nmean_s = np.float32(neg_l.mean())
            loss_s = np.float32(pmean_s + nmean_s)

        if return_triplet_indexes:
            return (loss_s, pmean_s, nmean_s, triplet_indexes)
        return loss_s


# -------------------------- demo --------------------------

if __name__ == "__main__":
    N, D = 8, 32
    key = jax.random.PRNGKey(0)
    k1, k2 = jax.random.split(key)
    embeddings = jax.random.normal(k1, (N, D), dtype=jnp.float32)
    p_embeddings = embeddings + 0.1 * jax.random.normal(k2, (N, D), dtype=jnp.float32)
    embedding_ids = ["id0", "id0", "id1", "id1", "id2", "id2", "id3", "id3"]

    # Run the fused Pallas distance kernel once and block on the result.
    dist_pad, pos_pad, _ = fused_pairwise_distances(embeddings, p_embeddings)
    jax.block_until_ready((dist_pad, pos_pad))
    dist_np = np.asarray(jax.device_get(dist_pad), np.float32)[:N, :N]
    pos_np = np.asarray(jax.device_get(pos_pad), np.float32)[:N]

    # Reference in float64.
    emb_np = np.asarray(jax.device_get(embeddings), np.float64)
    pemb_np = np.asarray(jax.device_get(p_embeddings), np.float64)
    diff_ij = emb_np[:, None, :] - emb_np[None, :, :] + EPS
    ref_d2 = np.sum(diff_ij * diff_ij, axis=-1)
    ref_dist = np.sqrt(ref_d2)
    ref_pos = np.sqrt(np.sum((emb_np - pemb_np + EPS) ** 2, axis=-1))

    # Positive distances use the exact direct-difference form -> tight tolerance.
    assert np.allclose(pos_np, ref_pos, rtol=1e-5, atol=1e-5)

    # NxN matrix uses the Gram trick with bf16 MXU operands: check squared distances
    # against a norm-scaled error bound (the honest error model for that formulation),
    # plus a tight relative check on all non-degenerate (off-diagonal) entries.  The
    # diagonal (self-pairs) is never a mining candidate and is excluded.
    ref_sq = np.sum(emb_np * emb_np, axis=-1)
    scale = ref_sq[:, None] + ref_sq[None, :] + 1.0
    assert np.all(np.abs(dist_np ** 2 - ref_d2) <= 2e-2 * scale)
    off_diag = ~np.eye(N, dtype=bool)
    assert np.allclose(dist_np[off_diag], ref_dist[off_diag], rtol=3e-2, atol=3e-2)

    # Full module forward (mining + reduction), cross-checked on the chosen triplets.
    loss_mod = CustomTripletMarginLossPallas(
        loss_type="triplet_margin_loss", margin=1,
        ratio_hard_easy_negative=0.8, p_norm=2, distance_metric="p_norm", seed=0)
    loss, pmean, nmean, triplets = loss_mod(
        embeddings, p_embeddings, embedding_ids, return_triplet_indexes=True)
    pos_t = np.array([ref_pos[a] for (a, _, _) in triplets])
    neg_t = np.array([ref_dist[a, nn] for (a, nn, _) in triplets])
    loss_ref = np.maximum(pos_t - neg_t + 1.0, 0.0).mean()
    assert abs(float(loss) - float(loss_ref)) < 5e-2
    assert abs(float(pmean) - float(pos_t.mean())) < 5e-2
    assert abs(float(nmean) - float(neg_t.mean())) < 5e-2

    jax.block_until_ready((dist_pad, pos_pad))
    print("KERNEL_OK")
</pallas_src>

<mosaic_0001>
module attributes {stable_mosaic.version = 11 : i64} {
  func.func @_dist_kernel(%arg0: i32, %arg1: i32, %arg2: memref<128x32xbf16, #tpu.memory_space<vmem>>, %arg3: memref<128x32xbf16, #tpu.memory_space<vmem>>, %arg4: memref<128x1xf32, #tpu.memory_space<vmem>>, %arg5: memref<1x128xf32, #tpu.memory_space<vmem>>, %arg6: memref<128x128xf32, #tpu.memory_space<vmem>>) attributes {dimension_semantics = [#tpu.dimension_semantics<parallel>, #tpu.dimension_semantics<parallel>], iteration_bounds = array<i64: 1, 1>, scalar_prefetch = 0 : i64, scratch_operands = 0 : i64, tpu.core_type = #tpu.core_type<tc>, window_params = [{transform_indices = @transform_0, window_bounds = array<i64: 128, 32>}, {transform_indices = @transform_1, window_bounds = array<i64: 128, 32>}, {transform_indices = @transform_2, window_bounds = array<i64: 128, 1>}, {transform_indices = @transform_3, window_bounds = array<i64: 1, 128>}, {transform_indices = @transform_4, window_bounds = array<i64: 128, 128>}]} {
    %c0 = arith.constant 0 : index
    %c0_0 = arith.constant 0 : index
    %0 = vector.load %arg2[%c0, %c0_0] : memref<128x32xbf16, #tpu.memory_space<vmem>>, vector<128x32xbf16>
    %c0_1 = arith.constant 0 : index
    %c0_2 = arith.constant 0 : index
    %1 = vector.load %arg3[%c0_1, %c0_2] : memref<128x32xbf16, #tpu.memory_space<vmem>>, vector<128x32xbf16>
    %cst = arith.constant dense<0.000000e+00> : vector<128x128xf32>
    %2 = tpu.matmul %0, %1, %cst {dimension_numbers = #tpu.dot_dimension_numbers<[1], [1], [0], [0], [0, 0, 1, 0], [], []>} : vector<128x32xbf16>, vector<128x32xbf16>, vector<128x128xf32> -> vector<128x128xf32>
    %c0_3 = arith.constant 0 : index
    %c0_4 = arith.constant 0 : index
    %3 = vector.load %arg4[%c0_3, %c0_4] : memref<128x1xf32, #tpu.memory_space<vmem>>, vector<128x1xf32>
    %c0_5 = arith.constant 0 : index
    %c0_6 = arith.constant 0 : index
    %4 = vector.load %arg5[%c0_5, %c0_6] : memref<1x128xf32, #tpu.memory_space<vmem>>, vector<1x128xf32>
    %5 = vector.broadcast %3 : vector<128x1xf32> to vector<128x128xf32>
    %6 = vector.broadcast %4 : vector<1x128xf32> to vector<128x128xf32>
    %7 = arith.addf %5, %6 : vector<128x128xf32>
    %cst_7 = arith.constant 2.000000e+00 : f32
    %8 = vector.broadcast %cst_7 : f32 to vector<128x128xf32>
    %9 = arith.mulf %8, %2 : vector<128x128xf32>
    %10 = arith.subf %7, %9 : vector<128x128xf32>
    %cst_8 = arith.constant 0.000000e+00 : f32
    %11 = vector.broadcast %cst_8 : f32 to vector<128x128xf32>
    %12 = arith.maximumf %10, %11 : vector<128x128xf32>
    %13 = math.sqrt %12 : vector<128x128xf32>
    %c0_9 = arith.constant 0 : index
    %c0_10 = arith.constant 0 : index
    %14 = vector.load %arg6[%c0_9, %c0_10] : memref<128x128xf32, #tpu.memory_space<vmem>>, vector<128x128xf32>
    tpu.vector_store %arg6[%c0_9, %c0_10], %13 {strides = array<i32>} : memref<128x128xf32, #tpu.memory_space<vmem>>, vector<128x128xf32>,
    return
  }
  func.func @transform_0(%arg0: i32, %arg1: i32) -> (i32, i32) {
    %c0_i32 = arith.constant 0 : i32
    %c0_i32_0 = arith.constant 0 : i32
    return %arg0, %c0_i32 : i32, i32
  }
  func.func @transform_1(%arg0: i32, %arg1: i32) -> (i32, i32) {
    %c0_i32 = arith.constant 0 : i32
    %c0_i32_0 = arith.constant 0 : i32
    return %arg1, %c0_i32 : i32, i32
  }
  func.func @transform_2(%arg0: i32, %arg1: i32) -> (i32, i32) {
    %c0_i32 = arith.constant 0 : i32
    %c0_i32_0 = arith.constant 0 : i32
    return %arg0, %c0_i32 : i32, i32
  }
  func.func @transform_3(%arg0: i32, %arg1: i32) -> (i32, i32) {
    %c0_i32 = arith.constant 0 : i32
    %c0_i32_0 = arith.constant 0 : i32
    return %c0_i32, %arg1 : i32, i32
  }
  func.func @transform_4(%arg0: i32, %arg1: i32) -> (i32, i32) {
    %c0_i32 = arith.constant 0 : i32
    return %arg0, %arg1 : i32, i32
  }
}

</mosaic_0001>

<bundles_post_ra>
// kernel: tpu_custom_call.1
= control target key start
LH: loop header
LB: loop body
LE: loop exit
PB: predicated region body
PF: predicated region fallthrough
CT: control target
= control target key end

     0   :  { %vm131_vm0 = vcmask 261120   ;;  %v771_v3 = vmov 0   ;;  %s1109_s0 = inlined_call_operand.vmem [shape: bf16[128,32], index: 0, kind: input, shape index: {}]   ;;  %s1110_s1 = inlined_call_operand.vmem [shape: bf16[128,32], index: 1, kind: input, shape index: {}]   ;;  %s1111_s2 = inlined_call_operand.vmem [shape: f32[128,1], index: 2, kind: input, shape index: {}]   ;;  %s1112_s3 = inlined_call_operand.vmem [shape: f32[1,128], index: 3, kind: input, shape index: {}]   ;;  %s1113_s4 = inlined_call_operand.hbm [shape: f32[128,128], index: 4, kind: output, shape index: {}]  }
   0x1   :  { %v699_v0 = vld [vmem:[%s1110_s1] sm:$0xff]   ;;  %v700_v1 = vld [vmem:[%s1110_s1 + $0x8] sm:$0xff]   ;;  %698 = vset.pattern.permute.xlu1 %v771_v3  ;;  %697 = vset.pattern.permute.xlu0 %v771_v3  ;;  %v701_v4 = vld [vmem:[%s1110_s1 + $0x10] sm:$0xff]  }
   0x2   :  { %677 = vmatprep.subr.msk.bf16.mxu0 %vm131_vm0, %v699_v0  ;;  %678 = vmatprep.subr.msk.bf16.mxu1 %vm131_vm0, %v699_v0  ;;  %v157_v2 = vsel %vm131_vm0, %v699_v0, 0  ;;  %v160_v5 = vsel %vm131_vm0, %v700_v1, 0  ;;  %v707_v6 = vld [vmem:[%s1109_s0] sm:$0xff]   ;;  %v163_v8 = vsel %vm131_vm0, %v701_v4, 0  ;;  %v702_v9 = vld [vmem:[%s1110_s1 + $0x18] sm:$0xff]   ;;  %v279_v10 = vld [vmem:[%s1111_s2 + $0x10] sm:$0xff] }
   0x3   :  { %630 = vmatpush3.bf16.xpose.msra.mxu0 %v157_v2  ;;  %669 = vmatpush3.bf16.xpose.msra.mxu1 %v157_v2  ;;  %v708_v7 = vld [vmem:[%s1109_s0 + $0x20] sm:$0xff]   ;;  %v280_v12 = vld [vmem:[%s1111_s2 + $0x18] sm:$0xff]  ;;  %v278_v13 = vld [vmem:[%s1111_s2 + $0x8] sm:$0xff] }
   0x4   :  { %679 = vmatprep.subr.msk.bf16.mxu0 %vm131_vm0, %v700_v1  ;;  %680 = vmatprep.subr.msk.bf16.mxu1 %vm131_vm0, %v700_v1  ;;  %v277_v11 = vld [vmem:[%s1111_s2] sm:$0xff] }
   0x5   :  { %645 = vmatprep.mubr.msk.bf16.mxu0 %vm131_vm0, %v707_v6  ;;  %653 = vmatprep.mubr.msk.bf16.mxu1 %vm131_vm0, %v708_v7 }
   0x6   :  { %306 = vperm.xlu1 %698, %v279_v10   ;;  %296 = vperm.xlu0 %697, %v277_v11  }
   0xa   :  { %311 = vperm.xlu1 %698, %v280_v12   ;;  %301 = vperm.xlu0 %697, %v278_v13  }
   0xb   :  { %632 = vmatpush3.bf16.xpose.msra.mxu0 %v160_v5  ;;  %670 = vmatpush3.bf16.xpose.msra.mxu1 %v160_v5 }
   0xc   :  { %681 = vmatprep.subr.msk.bf16.mxu0 %vm131_vm0, %v701_v4  ;;  %682 = vmatprep.subr.msk.bf16.mxu1 %vm131_vm0, %v701_v4 }
  0x13   :  { %634 = vmatpush3.bf16.xpose.msra.mxu0 %v163_v8  ;;  %671 = vmatpush3.bf16.xpose.msra.mxu1 %v163_v8 }
  0x14   :  { %683 = vmatprep.subr.msk.bf16.mxu0 %vm131_vm0, %v702_v9  ;;  %684 = vmatprep.subr.msk.bf16.mxu1 %vm131_vm0, %v702_v9 }
  0x15   :  { %9 = vsyncpa [#allocation3], 0  ;;  %v282_v14 = vld [vmem:[%s1111_s2 + $0x28] sm:$0xff]  ;;  %v281_v15 = vld [vmem:[%s1111_s2 + $0x20] sm:$0xff]  ;;  %v166_v16 = vsel %vm131_vm0, %v702_v9, 0 }
  0x16   :  { %v703_v17 = vld [vmem:[%s1110_s1 + $0x20] sm:$0xff]   ;;  %321 = vperm.xlu1 %698, %v282_v14   ;;  %316 = vperm.xlu0 %697, %v281_v15   ;;  %v284_v18 = vld [vmem:[%s1111_s2 + $0x38] sm:$0xff]  ;;  %v283_v19 = vld [vmem:[%s1111_s2 + $0x30] sm:$0xff] }
  0x17   :  { %v286_v20 = vld [vmem:[%s1111_s2 + $0x48] sm:$0xff]  ;;  %v285_v21 = vld [vmem:[%s1111_s2 + $0x40] sm:$0xff]  ;;  %v169_v22 = vsel %vm131_vm0, %v703_v17, 0  ;;  %v288_v24 = vld [vmem:[%s1111_s2 + $0x58] sm:$0xff] }
  0x18   :  { %v704_v23 = vld [vmem:[%s1110_s1 + $0x28] sm:$0xff]   ;;  %v287_v25 = vld [vmem:[%s1111_s2 + $0x50] sm:$0xff]  ;;  %v289_v27 = vld [vmem:[%s1111_s2 + $0x60] sm:$0xff] }
  0x19   :  { %v290_v26 = vld [vmem:[%s1111_s2 + $0x68] sm:$0xff]  ;;  %v172_v28 = vsel %vm131_vm0, %v704_v23, 0  ;;  %v705_v29 = vld [vmem:[%s1110_s1 + $0x30] sm:$0xff]   ;;  %v292_v30 = vld [vmem:[%s1111_s2 + $0x78] sm:$0xff] }
  0x1a   :  { %331 = vperm.xlu1 %698, %v284_v18   ;;  %326 = vperm.xlu0 %697, %v283_v19   ;;  %v291_v31 = vld [vmem:[%s1111_s2 + $0x70] sm:$0xff]  ;;  %v175_v32 = vsel %vm131_vm0, %v705_v29, 0  ;;  %v706_v33 = vld [vmem:[%s1110_s1 + $0x38] sm:$0xff]   ;;  %v709_v35 = vld [vmem:[%s1109_s0 + $0x8] sm:$0xff]  }
  0x1b   :  { %636 = vmatpush3.bf16.xpose.msra.mxu0 %v166_v16  ;;  %672 = vmatpush3.bf16.xpose.msra.mxu1 %v166_v16  ;;  %v178_v34 = vsel %vm131_vm0, %v706_v33, 0  ;;  %v710_v36 = vld [vmem:[%s1109_s0 + $0x28] sm:$0xff]   ;;  %v711_v37 = vld [vmem:[%s1109_s0 + $0x10] sm:$0xff]   ;;  %v713_v39 = vld [vmem:[%s1109_s0 + $0x18] sm:$0xff]  }
  0x1c   :  { %685 = vmatprep.subr.msk.bf16.mxu0 %vm131_vm0, %v703_v17  ;;  %686 = vmatprep.subr.msk.bf16.mxu1 %vm131_vm0, %v703_v17  ;;  %v712_v38 = vld [vmem:[%s1109_s0 + $0x30] sm:$0xff]   ;;  %v714_v40 = vld [vmem:[%s1109_s0 + $0x38] sm:$0xff]   ;;  %v931_v53 = vld [vmem:[%s1112_s3] ss:$0 sm:$0xff]  ;;  %s772_s0 = smov [#allocation2]  }
  0x1d   :  { %s577_s3 = sshll.u32 %s772_s0, 4  ;;  %s578_s3 = int_to_ptr.vmem [resolvable:$true] %s577_s3 }
  0x1e   :  { %341 = vperm.xlu1 %698, %v286_v20   ;;  %336 = vperm.xlu0 %697, %v285_v21   ;;  %s747_s27 = scalar_lea.vmem %s578_s3, 2048  ;;  %p752_p1 = scmp.lt.s32.totalorder %s578_s3, %s578_s3 }
  0x1f   :  { %p748_p0 = scmp.ne.s32.totalorder %s578_s3, %s747_s27  ;;  %p753_p2 = scmp.lt.s32.totalorder %s747_s27, %s747_s27 }
  0x21   :  { %p754_p3 = por %p753_p2, %p752_p1 }
  0x22   :  { %351 = vperm.xlu1 %698, %v288_v24   ;;  %346 = vperm.xlu0 %697, %v287_v25  }
  0x23   :  { %638 = vmatpush3.bf16.xpose.msra.mxu0 %v169_v22  ;;  %673 = vmatpush3.bf16.xpose.msra.mxu1 %v169_v22  ;;  %p755_p4 = pnand %p754_p3, %p748_p0 }
  0x24   :  { %687 = vmatprep.subr.msk.bf16.mxu0 %vm131_vm0, %v704_v23  ;;  %688 = vmatprep.subr.msk.bf16.mxu1 %vm131_vm0, %v704_v23 }
  0x26   :  { %361 = vperm.xlu1 %698, %v290_v26   ;;  %356 = vperm.xlu0 %697, %v289_v27  }
  0x2a   :  { %371 = vperm.xlu1 %698, %v292_v30   ;;  %366 = vperm.xlu0 %697, %v291_v31  }
  0x2b   :  { %640 = vmatpush3.bf16.xpose.msra.mxu0 %v172_v28  ;;  %674 = vmatpush3.bf16.xpose.msra.mxu1 %v172_v28 }
  0x2c   :  { %689 = vmatprep.subr.msk.bf16.mxu0 %vm131_vm0, %v705_v29  ;;  %690 = vmatprep.subr.msk.bf16.mxu1 %vm131_vm0, %v705_v29 }
  0x33   :  { %642 = vmatpush3.bf16.xpose.msra.mxu0 %v175_v32  ;;  %675 = vmatpush3.bf16.xpose.msra.mxu1 %v175_v32 }
  0x34   :  { %691 = vmatprep.subr.msk.bf16.mxu0 %vm131_vm0, %v706_v33  ;;  %692 = vmatprep.subr.msk.bf16.mxu1 %vm131_vm0, %v706_v33 }
  0x3b   :  { %644 = vmatpush3.bf16.xpose.msra.mxu0 %v178_v34  ;;  %676 = vmatpush3.bf16.xpose.msra.mxu1 %v178_v34 }
  0x42   :  { %646 = vmatmul.mubr.msk.bf16.vlgmr.msra.gmra.mrb[0].mxu0 %vm131_vm0, %v709_v35  ;;  %654 = vmatmul.mubr.msk.bf16.vlgmr.msra.gmra.mrb[0].mxu1 %vm131_vm0, %v710_v36 }
  0x43   :  { %649 = vmatprep.mubr.msk.bf16.mxu0 %vm131_vm0, %v711_v37  ;;  %657 = vmatprep.mubr.msk.bf16.mxu1 %vm131_vm0, %v712_v38 }
  0x4a   :  { %650 = vmatmul.mubr.msk.bf16.gmra.mrb[4].mxu0 %vm131_vm0, %v713_v39  ;;  %658 = vmatmul.mubr.msk.bf16.gmra.mrb[4].mxu1 %vm131_vm0, %v714_v40 }
  0x85   :  { %v307_v41 = vpop.permute.xlu1 %306  ;;  %v297_v42 = vpop.permute.xlu0 %296 }
  0x86   :  { %v382_v56 = vadd.f32 %v931_v53, %v307_v41  ;;  %v380_v59 = vadd.f32 %v931_v53, %v297_v42 }
  0x89   :  { %v312_v43 = vpop.permute.xlu1 %311  ;;  %v302_v44 = vpop.permute.xlu0 %301 }
  0x8a   :  { %v383_v1 = vadd.f32 %v931_v53, %v312_v43  ;;  %v381_v17 = vadd.f32 %v931_v53, %v302_v44 }
  0x95   :  { %v322_v45 = vpop.permute.xlu1 %321  ;;  %v317_v46 = vpop.permute.xlu0 %316 }
  0x96   :  { %v953_v29 = vadd.f32 %v931_v53, %v322_v45  ;;  %v384_v33 = vadd.f32 %v931_v53, %v317_v46 }
  0x99   :  { %v332_v47 = vpop.permute.xlu1 %331  ;;  %v327_v48 = vpop.permute.xlu0 %326 }
  0x9a   :  { %v958_v34 = vadd.f32 %v931_v53, %v332_v47  ;;  %v386_v35 = vadd.f32 %v931_v53, %v327_v48 }
  0x9d   :  { %v342_v49 = vpop.permute.xlu1 %341  ;;  %v337_v50 = vpop.permute.xlu0 %336 }
  0x9e   :  { %v388_v2 = vadd.f32 %v931_v53, %v337_v50  ;;  %v389_v21 = vadd.f32 %v931_v53, %v342_v49 }
  0xa1   :  { %v352_v51 = vpop.permute.xlu1 %351  ;;  %v347_v52 = vpop.permute.xlu0 %346 }
  0xa2   :  { %v390_v60 = vadd.f32 %v931_v53, %v347_v52  ;;  %v391_v18 = vadd.f32 %v931_v53, %v352_v51 }
  0xa5   :  { %v933_v54 = vpop.permute.xlu1 %361  ;;  %v357_v55 = vpop.permute.xlu0 %356 }
  0xa6   :  { %v963_v38 = vadd.f32 %v931_v53, %v357_v55 }
  0xa9   :  { %v372_v24 = vpop.permute.xlu1 %371  ;;  %v367_v25 = vpop.permute.xlu0 %366 }
  0xaa   :  { %v966_v39 = vadd.f32 %v931_v53, %v372_v24  ;;  %v394_v40 = vadd.f32 %v931_v53, %v367_v25 }
 0x115   :  { %v647_v57 = vpop.f32.mrb[0].mxu0  ;;  %v655_v58 = vpop.f32.mrb[0].mxu1 }
 0x116   :  { %v398_v61 = vmul.f32 2.0, %v647_v57  ;;  %v406_v62 = vmul.f32 2.0, %v655_v58  ;;  %v214_v63 = vpop.f32.mrb[1].mxu0  ;;  %v246_v0 = vpop.f32.mrb[1].mxu1 }
 0x117   :  { %v396_v3 = vmul.f32 2.0, %v214_v63  ;;  %v404_v4 = vmul.f32 2.0, %v246_v0  ;;  %v648_v5 = vpop.f32.mrb[2].mxu0  ;;  %v656_v6 = vpop.f32.mrb[2].mxu1 }
 0x118   :  { %v414_v7 = vsub.f32 %v382_v56, %v398_v61  ;;  %v422_v8 = vsub.f32 %v390_v60, %v406_v62  ;;  %v399_v9 = vmul.f32 2.0, %v648_v5  ;;  %v407_v10 = vmul.f32 2.0, %v656_v6  ;;  %v217_v11 = vpop.f32.mrb[3].mxu0  ;;  %v249_v12 = vpop.f32.mrb[3].mxu1 }
 0x119   :  { %v412_v13 = vsub.f32 %v380_v59, %v396_v3  ;;  %v420_v14 = vsub.f32 %v388_v2, %v404_v4  ;;  %v397_v15 = vmul.f32 2.0, %v217_v11  ;;  %v405_v16 = vmul.f32 2.0, %v249_v12 }
 0x11a   :  { %v942_v19 = vmax.f32 %v414_v7, 0.0  ;;  %v944_v20 = vmax.f32 %v422_v8, 0.0  ;;  %v415_v26 = vsub.f32 %v383_v1, %v399_v9  ;;  %v423_v27 = vsub.f32 %v391_v18, %v407_v10 }
 0x11b   :  { %v947_v22 = vmax.f32 %v412_v13, 0.0  ;;  %v949_v23 = vmax.f32 %v420_v14, 0.0  ;;  %v413_v28 = vsub.f32 %v381_v17, %v397_v15  ;;  %v421_v30 = vsub.f32 %v389_v21, %v405_v16 }
 0x11c   :  { %715 = vrsqrt.f32 %v942_v19  ;;  %vm460_vm1 = vcmp.eq.f32.partialorder %v942_v19, inf  ;;  %v973_v43 = vmax.f32 %v415_v26, 0.0  ;;  %v975_v44 = vmax.f32 %v423_v27, 0.0 }
 0x11d   :  { %717 = vrsqrt.f32 %v944_v20  ;;  %v651_v31 = vpop.f32.mrb[4].mxu0  ;;  %v659_v32 = vpop.f32.mrb[4].mxu1  ;;  %v977_v45 = vmax.f32 %v413_v28, 0.0  ;;  %vm462_vm2 = vcmp.eq.f32.partialorder %v942_v19, 0.0  ;;  %v463_v48 = vand.u32 2147483648, %v942_v19 }
 0x11e   :  { %719 = vrsqrt.f32 %v947_v22  ;;  %v230_v36 = vpop.f32.mrb[5].mxu0  ;;  %v262_v37 = vpop.f32.mrb[5].mxu1  ;;  %vm516_vm3 = vcmp.eq.f32.partialorder %v944_v20, inf  ;;  %v986_v49 = vmax.f32 %v421_v30, 0.0  ;;  %v402_v50 = vmul.f32 2.0, %v651_v31 }
 0x11f   :  { %721 = vrsqrt.f32 %v949_v23  ;;  %v652_v41 = vpop.f32.mrb[6].mxu0  ;;  %v970_v42 = vpop.f32.mrb[6].mxu1  ;;  %v410_v51 = vmul.f32 2.0, %v659_v32  ;;  %v400_v52 = vmul.f32 2.0, %v230_v36  ;;  %vm518_vm4 = vcmp.eq.f32.partialorder %v944_v20, 0.0 }
 0x120   :  { %v979_v46 = vpop.f32.mrb[7].mxu0  ;;  %v981_v47 = vpop.f32.mrb[7].mxu1  ;;  %723 = vrsqrt.f32 %v973_v43  ;;  %v519_v55 = vand.u32 2147483648, %v944_v20  ;;  %vm446_vm5 = vcmp.eq.f32.partialorder %v947_v22, inf  ;;  %vm448_vm6 = vcmp.eq.f32.partialorder %v947_v22, 0.0 }
 0x121   :  { %725 = vrsqrt.f32 %v975_v44  ;;  %v449_v56 = vand.u32 2147483648, %v947_v22  ;;  %v408_v57 = vmul.f32 2.0, %v262_v37  ;;  %vm502_vm7 = vcmp.eq.f32.partialorder %v949_v23, inf }
 0x122   :  { %727 = vrsqrt.f32 %v977_v45  ;;  %vm504_vm8 = vcmp.eq.f32.partialorder %v949_v23, 0.0  ;;  %v505_v58 = vand.u32 2147483648, %v949_v23  ;;  %vm467_vm9 = vcmp.eq.f32.partialorder %v973_v43, inf }
 0x123   :  { %729 = vrsqrt.f32 %v986_v49  ;;  %v418_v60 = vsub.f32 %v386_v35, %v402_v50  ;;  %v426_v61 = vsub.f32 %v394_v40, %v410_v51  ;;  %v416_v62 = vsub.f32 %v384_v33, %v400_v52 }
 0x124   :  { %vm469_vm10 = vcmp.eq.f32.partialorder %v973_v43, 0.0  ;;  %v470_v1 = vand.u32 2147483648, %v973_v43  ;;  %vm523_vm11 = vcmp.eq.f32.partialorder %v975_v44, inf  ;;  %v424_v6 = vsub.f32 %v963_v38, %v408_v57 }
 0x125   :  { %v1006_v4 = vmax.f32 %v418_v60, 0.0  ;;  %v1008_v5 = vmax.f32 %v426_v61, 0.0  ;;  %v1015_v10 = vmax.f32 %v416_v62, 0.0  ;;  %v403_v11 = vmul.f32 2.0, %v652_v41 }
 0x126   :  { %v716_v59 = vpop.eup %715  ;;  %vm525_vm12 = vcmp.eq.f32.partialorder %v975_v44, 0.0  ;;  %v526_v17 = vand.u32 2147483648, %v975_v44  ;;  %vm453_vm13 = vcmp.eq.f32.partialorder %v977_v45, inf  ;;  %vm455_vm14 = vcmp.eq.f32.partialorder %v977_v45, 0.0 }
 0x127   :  { %v718_v63 = vpop.eup %717  ;;  %v459_v0 = vmul.f32 %v716_v59, %v942_v19  ;;  %731 = vrsqrt.f32 %v1006_v4  ;;  %v456_v28 = vand.u32 2147483648, %v977_v45  ;;  %v419_v30 = vsub.f32 %v958_v34, %v403_v11 }
 0x128   :  { %v720_v2 = vpop.eup %719  ;;  %v515_v3 = vmul.f32 %v718_v63, %v944_v20  ;;  %733 = vrsqrt.f32 %v1008_v5  ;;  %v411_v33 = vmul.f32 2.0, %v970_v42  ;;  %v401_v35 = vmul.f32 2.0, %v979_v46 }
 0x129   :  { %v722_v7 = vpop.eup %721  ;;  %v461_v8 = vsel %vm460_vm1, %v942_v19, %v459_v0  ;;  %v445_v9 = vmul.f32 %v720_v2, %v947_v22  ;;  %735 = vrsqrt.f32 %v1015_v10  ;;  %vm509_vm15 = vcmp.eq.f32.partialorder %v986_v49, inf }
 0x12a   :  { %v464_v12 = vsel %vm462_vm2, %v463_v48, %v461_v8  ;;  %v517_v13 = vsel %vm516_vm3, %v944_v20, %v515_v3  ;;  %v501_v14 = vmul.f32 %v722_v7, %v949_v23  ;;  %v724_v18 = vpop.eup %723  ;;  %v1037_v20 = vmax.f32 %v424_v6, 0.0 }
 0x12b   :  { %558 = vst [vmem:[#allocation2 + $0x10] sm:$0xff] %v464_v12  ;;  %v520_v15 = vsel %vm518_vm4, %v519_v55, %v517_v13  ;;  %v447_v16 = vsel %vm446_vm5, %v947_v22, %v445_v9  ;;  %v726_v24 = vpop.eup %725  ;;  %v466_v26 = vmul.f32 %v724_v18, %v973_v43  ;;  %v512_v41 = vand.u32 2147483648, %v986_v49 }
 0x12c   :  { %566 = vst [vmem:[#allocation2 + $0x50] sm:$0xff] %v520_v15  ;;  %v450_v19 = vsel %vm448_vm6, %v449_v56, %v447_v16  ;;  %v503_v21 = vsel %vm502_vm7, %v949_v23, %v501_v14  ;;  %v728_v22 = vpop.eup %727  ;;  %v522_v27 = vmul.f32 %v726_v24, %v975_v44  ;;  %737 = vrsqrt.f32 %v1037_v20 }
 0x12d   :  { %556 = vst [vmem:[#allocation2] sm:$0xff] %v450_v19  ;;  %v506_v25 = vsel %vm504_vm8, %v505_v58, %v503_v21  ;;  %v730_v31 = vpop.eup %729  ;;  %v468_v23 = vsel %vm467_vm9, %v973_v43, %v466_v26  ;;  %v452_v32 = vmul.f32 %v728_v22, %v977_v45  ;;  %vm511_vm0 = vcmp.eq.f32.partialorder %v986_v49, 0.0 }
 0x12e   :  { %564 = vst [vmem:[#allocation2 + $0x40] sm:$0xff] %v506_v25  ;;  %v471_v36 = vsel %vm469_vm10, %v470_v1, %v468_v23  ;;  %v524_v37 = vsel %vm523_vm11, %v975_v44, %v522_v27  ;;  %v508_v34 = vmul.f32 %v730_v31, %v986_v49  ;;  %v435_v46 = vmax.f32 %v419_v30, 0.0 }
 0x12f   :  { %559 = vst [vmem:[#allocation2 + $0x18] sm:$0xff] %v471_v36  ;;  %v527_v38 = vsel %vm525_vm12, %v526_v17, %v524_v37  ;;  %v454_v40 = vsel %vm453_vm13, %v977_v45, %v452_v32  ;;  %v427_v48 = vsub.f32 %v966_v39, %v411_v33  ;;  %v417_v50 = vsub.f32 %v953_v29, %v401_v35 }
 0x130   :  { %567 = vst [vmem:[#allocation2 + $0x58] sm:$0xff] %v527_v38  ;;  %v457_v42 = vsel %vm455_vm14, %v456_v28, %v454_v40  ;;  %v510_v43 = vsel %vm509_vm15, %v986_v49, %v508_v34  ;;  %v409_v51 = vmul.f32 2.0, %v981_v47  ;;  %v393_v55 = vadd.f32 %v931_v53, %v933_v54 }
 0x131   :  { %557 = vst [vmem:[#allocation2 + $0x8] sm:$0xff] %v457_v42  ;;  %v513_v44 = vsel %vm511_vm0, %v512_v41, %v510_v43  ;;  %v732_v52 = vpop.eup %731  ;;  %739 = vrsqrt.f32 %v435_v46  ;;  %v443_v56 = vmax.f32 %v427_v48, 0.0  ;;  %v433_v57 = vmax.f32 %v417_v50, 0.0 }
 0x132   :  { %565 = vst [vmem:[#allocation2 + $0x48] sm:$0xff] %v513_v44  ;;  %v487_v45 = vmul.f32 %v732_v52, %v1006_v4  ;;  %v734_v49 = vpop.eup %733  ;;  %vm488_vm1 = vcmp.eq.f32.partialorder %v1006_v4, inf  ;;  %v491_v58 = vand.u32 2147483648, %v1006_v4  ;;  %v425_v39 = vsub.f32 %v393_v55, %v409_v51 }
 0x133   :  { %vm490_vm2 = vcmp.eq.f32.partialorder %v1006_v4, 0.0  ;;  %v543_v47 = vmul.f32 %v734_v49, %v1008_v5  ;;  %741 = vrsqrt.f32 %v443_v56  ;;  %v736_v53 = vpop.eup %735  ;;  %vm544_vm3 = vcmp.eq.f32.partialorder %v1008_v5, inf }
 0x134   :  { %v489_v29 = vsel %vm488_vm1, %v1006_v4, %v487_v45  ;;  %v547_v59 = vand.u32 2147483648, %v1008_v5  ;;  %743 = vrsqrt.f32 %v433_v57  ;;  %vm546_vm4 = vcmp.eq.f32.partialorder %v1008_v5, 0.0 }
 0x135   :  { %v492_v54 = vsel %vm490_vm2, %v491_v58, %v489_v29  ;;  %v545_v60 = vsel %vm544_vm3, %v1008_v5, %v543_v47  ;;  %v473_v61 = vmul.f32 %v736_v53, %v1015_v10  ;;  %vm474_vm5 = vcmp.eq.f32.partialorder %v1015_v10, inf }
 0x136   :  { %562 = vst [vmem:[#allocation2 + $0x30] sm:$0xff] %v492_v54  ;;  %v738_v62 = vpop.eup %737  ;;  %v548_v63 = vsel %vm546_vm4, %v547_v59, %v545_v60  ;;  %v477_v0 = vand.u32 2147483648, %v1015_v10  ;;  %v441_v1 = vmax.f32 %v425_v39, 0.0  ;;  %vm476_vm6 = vcmp.eq.f32.partialorder %v1015_v10, 0.0 }
 0x137   :  { %570 = vst [vmem:[#allocation2 + $0x70] sm:$0xff] %v548_v63  ;;  %v475_v2 = vsel %vm474_vm5, %v1015_v10, %v473_v61  ;;  %v529_v3 = vmul.f32 %v738_v62, %v1037_v20  ;;  %vm530_vm7 = vcmp.eq.f32.partialorder %v1037_v20, inf  ;;  %v533_v5 = vand.u32 2147483648, %v1037_v20 }
 0x138   :  { %v478_v4 = vsel %vm476_vm6, %v477_v0, %v475_v2  ;;  %745 = vrsqrt.f32 %v441_v1  ;;  %vm532_vm8 = vcmp.eq.f32.partialorder %v1037_v20, 0.0  ;;  %vm495_vm9 = vcmp.eq.f32.partialorder %v435_v46, inf }
 0x139   :  { %560 = vst [vmem:[#allocation2 + $0x20] sm:$0xff] %v478_v4  ;;  %v531_v6 = vsel %vm530_vm7, %v1037_v20, %v529_v3  ;;  %v498_v11 = vand.u32 2147483648, %v435_v46  ;;  %vm497_vm10 = vcmp.eq.f32.partialorder %v435_v46, 0.0  ;;  %vm551_vm11 = vcmp.eq.f32.partialorder %v443_v56, inf }
 0x13a   :  { %v534_v8 = vsel %vm532_vm8, %v533_v5, %v531_v6  ;;  %v554_v16 = vand.u32 2147483648, %v443_v56  ;;  %vm553_vm12 = vcmp.eq.f32.partialorder %v443_v56, 0.0  ;;  %vm481_vm13 = vcmp.eq.f32.partialorder %v433_v57, inf }
 0x13b   :  { %v740_v7 = vpop.eup %739  ;;  %568 = vst [vmem:[#allocation2 + $0x60] sm:$0xff] %v534_v8  ;;  %v484_v19 = vand.u32 2147483648, %v433_v57  ;;  %vm483_vm14 = vcmp.eq.f32.partialorder %v433_v57, 0.0  ;;  %vm537_vm15 = vcmp.eq.f32.partialorder %v441_v1, inf  ;;  %v540_v22 = vand.u32 2147483648, %v441_v1 }
 0x13c   :  { %v494_v9 = vmul.f32 %v740_v7, %v435_v46  ;;  %vm539_vm0 = vcmp.eq.f32.partialorder %v441_v1, 0.0 }
 0x13d   :  { %v742_v10 = vpop.eup %741 }
 0x13e   :  { %v496_v12 = vsel %vm495_vm9, %v435_v46, %v494_v9  ;;  %v744_v13 = vpop.eup %743  ;;  %v550_v15 = vmul.f32 %v742_v10, %v443_v56 }
 0x13f   :  { %v499_v14 = vsel %vm497_vm10, %v498_v11, %v496_v12  ;;  %v480_v17 = vmul.f32 %v744_v13, %v433_v57 }
 0x140   :  { %563 = vst [vmem:[#allocation2 + $0x38] sm:$0xff] %v499_v14  ;;  %v552_v18 = vsel %vm551_vm11, %v443_v56, %v550_v15 }
 0x141   :  { %v555_v21 = vsel %vm553_vm12, %v554_v16, %v552_v18  ;;  %v482_v20 = vsel %vm481_vm13, %v433_v57, %v480_v17 }
 0x142   :  { %v746_v24 = vpop.eup %745  ;;  %571 = vst [vmem:[#allocation2 + $0x78] sm:$0xff] %v555_v21  ;;  %v485_v25 = vsel %vm483_vm14, %v484_v19, %v482_v20 }
 0x143   :  { %561 = vst [vmem:[#allocation2 + $0x28] sm:$0xff] %v485_v25  ;;  %v536_v26 = vmul.f32 %v746_v24, %v441_v1 }
 0x145   :  { %v538_v27 = vsel %vm537_vm15, %v441_v1, %v536_v26 }
 0x146   :  { %v541_v28 = vsel %vm539_vm0, %v540_v22, %v538_v27 }
 0x147   :  { %569 = vst [vmem:[#allocation2 + $0x68] sm:$0xff] %v541_v28 }
 0x148   :  { %758 = shalt.err (!%p755_p4)
}
 0x149   :  { %s759_s30 = scalar_lea.hbm %s1113_s4, 2048 }
 0x14a   :  { %p760_p5 = scmp.ne.s32.totalorder %s1113_s4, %s759_s30  ;;  %p763_p6 = scmp.lt.u32.totalorder %s759_s30, %s1113_s4 }
 0x14c   :  { %p765_p7 = pnand %p763_p6, %p760_p5 }
 0x14e   :  { %768 = shalt.err (!%p765_p7)
}
 0x14f   :  { %s773_s9 = smov 128   ;;  %s774_s10 = smov 8  }
 0x150   :  { %583 = dma.vmem_to_hbm [thread:$0]  %s578_s3, 2048, %s1113_s4, [#allocation3], %s773_s9, %s773_s9, %s774_s10  }
 0x151   :  { %769 = dma.done.wait [#allocation3], 2048  }
 0x152   :  { %770 = vsyncadd [#allocation3], 4294965248 }
 0x153   :  { %587 = vsyncpa [#allocation3], 1 }

</bundles_post_ra>
